<compile_context>
chip_gen: v7x
topology: tpu7x:2x2x1
jax: 0.10.0
libtpu: 0.0.40
codegen_flags: <defaults>
</compile_context>

<pallas_src>
from functools import partial

import numpy as np
import jax
import jax.numpy as jnp
from jax.experimental import pallas as pl
from jax.experimental.pallas import tpu as pltpu

EPS = 1e-12

# Flip to run the distance cross-term in bf16 on the MXU (2-3x MXU throughput,
# half the tile bytes).  Default False so beam-search ranking matches the f32
# reference exactly.
USE_BF16_CROSS = False


def _round_up(a, b):
    return ((a + b - 1) // b) * b


# ----------------------------------------------------------------------------
# Per-chip VMEM sizing (v7x: 64 MiB physical -> 32 MiB scoped; v5e/v6e: 128 MiB
# physical -> 64 MiB scoped).  Conservative 32 MiB fallback if the query fails.
# ----------------------------------------------------------------------------
def _detect_vmem_limit():
    try:
        cap = getattr(pltpu.get_tpu_info(), "vmem_capacity_bytes", None)
    except Exception:
        cap = None
    if not cap:
        return 32 * 1024 * 1024
    return int(min(cap // 2, 64 * 1024 * 1024))


_VMEM_LIMIT = _detect_vmem_limit()
_TILE_BUDGET = int(_VMEM_LIMIT * 0.75)          # headroom for compiler scratch
_MAX_ROW_TILE = 1024 if _VMEM_LIMIT >= 64 * 1024 * 1024 else 512
_MAX_COL_TILE = 512                              # multiple of 128; Mp padded to it

_PAR2 = pltpu.CompilerParams(dimension_semantics=("parallel", "parallel"),
                             vmem_limit_bytes=_VMEM_LIMIT)
_PAR1 = pltpu.CompilerParams(dimension_semantics=("parallel",),
                             vmem_limit_bytes=_VMEM_LIMIT)


# ----------------------------------------------------------------------------
# Tile-size helpers (all static, evaluated at trace time)
# ----------------------------------------------------------------------------
def _dist_tile_bytes(tn, tm, d):
    # double-buffered f32 tiles: x (tn,d) + xsq (tn,1) + 2c (tm,d) + csq (1,tm)
    # + out (tn,tm)
    return 8 * (tn * d + tn + tm * d + tm + tn * tm)


def _distance_tiles(n_rows, mp, d):
    col_cands = []
    for c in (min(mp, _MAX_COL_TILE), 256, 128):
        if c <= mp and mp % c == 0 and c not in col_cands:
            col_cands.append(c)
    row_max = min(_MAX_ROW_TILE, _round_up(max(n_rows, 1), 8))
    for tm in col_cands:                      # shrink rows first, cols last
        tn = row_max
        while True:
            if _dist_tile_bytes(tn, tm, d) <= _TILE_BUDGET:
                return tn, tm
            if tn <= 8:
                break
            tn = max(8, (tn // 2) // 8 * 8)
    return 8, col_cands[-1]


def _row_tile(n_rows, d, n_arrays):
    tn = min(_MAX_ROW_TILE, _round_up(max(n_rows, 1), 8))
    while tn > 8 and 8 * n_arrays * tn * d > _TILE_BUDGET:
        tn = max(8, (tn // 2) // 8 * 8)
    return tn


def _mse_batch_tile(b, w2, d):
    limit = _round_up(max(b, 1), 8)
    for tb in (128, 64, 32, 16, 8, 4, 2, 1):
        if tb <= limit and 8 * tb * (d + w2 * d + w2) <= _TILE_BUDGET:
            return tb
    return 1


# ----------------------------------------------------------------------------
# Pallas kernels
# ----------------------------------------------------------------------------
def _distance_kernel(x_ref, xsq_ref, cb2_ref, cbsq_ref, out_ref):
    # x: (tn, D), xsq: (tn, 1), cb2 = 2*codebook: (tm, D), cbsq: (1, tm)
    # out[i, j] = ||x_i||^2 - x_i . (2 c_j) + ||c_j||^2
    x = x_ref[...]
    cb2 = cb2_ref[...]
    if USE_BF16_CROSS:
        cross = jax.lax.dot_general(
            x.astype(jnp.bfloat16), cb2.astype(jnp.bfloat16),
            (((1,), (1,)), ((), ())), preferred_element_type=jnp.float32)
    else:
        cross = jax.lax.dot_general(
            x, cb2, (((1,), (1,)), ((), ())), preferred_element_type=jnp.float32)
    # ||x||^2 (hoisted, computed once per row) and ||c||^2 (precomputed, +inf on
    # padded columns) arrive as lane/sublane-broadcast VPU adds.
    out_ref[...] = (xsq_ref[...] - cross) + cbsq_ref[...]


def _mse_kernel(x_ref, q_ref, out_ref):
    # x: (tb, 1, D) broadcasts in-vreg against q: (tb, W2, D) -> out: (tb, 1, W2)
    d = q_ref[...] - x_ref[...]
    m = jnp.mean(d * d, axis=2)                      # (tb, W2)
    out_ref[...] = m[:, None, :]


def _nsvq_kernel(x_ref, q_ref, r_ref, out_ref):
    # noise substitution VQ: x + (||x - q|| / ||r|| + eps) * r
    x = x_ref[...]
    q = q_ref[...]
    r = r_ref[...]
    dq = x - q
    norm_q = jnp.sqrt(jnp.sum(dq * dq, axis=1, keepdims=True))
    norm_r = jnp.sqrt(jnp.sum(r * r, axis=1, keepdims=True))
    out_ref[...] = x + (norm_q / norm_r + EPS) * r


# ----------------------------------------------------------------------------
# Pallas wrappers (plain helpers traced inside the jitted device functions)
# ----------------------------------------------------------------------------
def _pairwise_sq_distances(x, cb2_pad, cb_sq_pad):
    # x: (N, D) f32, cb2_pad: (Mp, D) f32 (= 2*codebook, zero pad rows),
    # cb_sq_pad: (1, Mp) f32 (+inf for pad columns)  ->  (N, Mp) f32
    n, d = x.shape
    mp = cb2_pad.shape[0]
    tn, tm = _distance_tiles(n, mp, d)
    n_pad = _round_up(n, tn)
    x_p = jnp.pad(x, ((0, n_pad - n), (0, 0)))
    x_sq = jnp.sum(x_p * x_p, axis=1, keepdims=True)            # hoisted ||x||^2
    out = pl.pallas_call(
        _distance_kernel,
        # codebook tile on the OUTER grid axis: its block index does not change
        # while the inner row axis sweeps, so the cb tile stays VMEM-resident.
        grid=(mp // tm, n_pad // tn),
        in_specs=[pl.BlockSpec((tn, d), lambda mi, ni: (ni, 0)),
                  pl.BlockSpec((tn, 1), lambda mi, ni: (ni, 0)),
                  pl.BlockSpec((tm, d), lambda mi, ni: (mi, 0)),
                  pl.BlockSpec((1, tm), lambda mi, ni: (0, mi))],
        out_specs=pl.BlockSpec((tn, tm), lambda mi, ni: (ni, mi)),
        out_shape=jax.ShapeDtypeStruct((n_pad, mp), jnp.float32),
        compiler_params=_PAR2,
    )(x_p, x_sq, cb2_pad, cb_sq_pad)
    return out[:n]


def _mse_rows(x, q):
    # x: (B, D), q: (B, W2, D)  ->  (B, W2) per-candidate mean squared error.
    # x is NOT replicated through HBM: it is a (tb, 1, D) block broadcast
    # against q inside the kernel.
    b, d = x.shape
    w2 = q.shape[1]
    tb = _mse_batch_tile(b, w2, d)
    b_pad = _round_up(b, tb)
    x3 = jnp.pad(x, ((0, b_pad - b), (0, 0)))[:, None, :]        # (B_pad, 1, D)
    q_p = jnp.pad(q, ((0, b_pad - b), (0, 0), (0, 0)))           # (B_pad, W2, D)
    out = pl.pallas_call(
        _mse_kernel,
        grid=(b_pad // tb,),
        in_specs=[pl.BlockSpec((tb, 1, d), lambda i: (i, 0, 0)),
                  pl.BlockSpec((tb, w2, d), lambda i: (i, 0, 0))],
        out_specs=pl.BlockSpec((tb, 1, w2), lambda i: (i, 0, 0)),
        out_shape=jax.ShapeDtypeStruct((b_pad, 1, w2), jnp.float32),
        compiler_params=_PAR1,
    )(x3, q_p)
    return out[:b, 0, :]


# ----------------------------------------------------------------------------
# Jitted device entry points (only small index arrays are copied D2H)
# ----------------------------------------------------------------------------
@partial(jax.jit, static_argnames=("beam_width",))
def _initial_topk_dev(x, cb2_pad, cb_sq_pad, *, beam_width):
    dist = _pairwise_sq_distances(x, cb2_pad, cb_sq_pad)
    _, idx = jax.lax.top_k(-dist, beam_width)          # pad cols are +inf -> never picked
    return idx.astype(jnp.int32)


@partial(jax.jit,
         static_argnames=("beam_width", "num_codebooks", "num_stages", "mult"))
def _beam_step_topk_dev(x, cb, cb2_pad, cb_sq_pad, tuples_so_far, *,
                        beam_width, num_codebooks, num_stages, mult):
    # x: (B, D), tuples_so_far: (B, W, mult) int32 (columns 0..iter of the beam).
    b, d = x.shape
    w = tuples_so_far.shape[1]
    # Remainder exactly as the reference computes it: the codeword of column
    # `iter_number` subtracted `iter_number + 1` times (repeated subtraction).
    q = jnp.take(cb, tuples_so_far[:, :, -1], axis=0)            # (B, W, D)
    rem = jnp.broadcast_to(x[:, None, :], (b, w, d))
    for _ in range(mult):
        rem = rem - q
    dist = _pairwise_sq_distances(rem.reshape(b * w, d), cb2_pad, cb_sq_pad)
    # Mask the stages already used by each beam candidate (+inf columns), same
    # ranking as the reference's NaN-codebook masking (masked cols sort last).
    stages_used = tuples_so_far // num_codebooks                  # (B, W, mult)
    forbidden = jnp.any(
        stages_used[..., None] == jnp.arange(num_stages)[None, None, None, :],
        axis=2)                                                   # (B, W, S)
    penalty = jnp.where(forbidden, jnp.inf, 0.0).astype(jnp.float32)
    penalty = penalty.reshape(b * w, num_stages)
    col_penalty = jnp.repeat(penalty, num_codebooks, axis=1)      # (R, S*nc)
    mp = dist.shape[1]
    col_penalty = jnp.pad(col_penalty,
                          ((0, 0), (0, mp - num_stages * num_codebooks)))
    _, idx = jax.lax.top_k(-(dist + col_penalty), beam_width)
    return idx.astype(jnp.int32)                                  # (B*W, W)


@partial(jax.jit, static_argnames=("beam_width",))
def _mse_topk_dev(x, cb, idx, penalty, *, beam_width):
    # x: (B, D), cb: (M, D), idx: (B, W2, K) int32, penalty: (W2,) (+inf for pads)
    b, d = x.shape
    w2, k = idx.shape[1], idx.shape[2]
    q = jnp.zeros((b, w2, d), jnp.float32)
    for i in range(k):                       # K is tiny & static
        q = q + jnp.take(cb, idx[:, :, i], axis=0)
    mse = _mse_rows(x, q) + penalty[None, :]
    _, top_idx = jax.lax.top_k(-mse, beam_width)
    return top_idx.astype(jnp.int32)         # (B, beam_width); col 0 == argmin


@jax.jit
def _nsvq_dev(x, q, rnd):
    n, d = x.shape
    tn = _row_tile(n, d, 4)
    n_pad = _round_up(n, tn)
    pad = ((0, n_pad - n), (0, 0))
    out = pl.pallas_call(
        _nsvq_kernel,
        grid=(n_pad // tn,),
        in_specs=[pl.BlockSpec((tn, d), lambda i: (i, 0)),
                  pl.BlockSpec((tn, d), lambda i: (i, 0)),
                  pl.BlockSpec((tn, d), lambda i: (i, 0))],
        out_specs=pl.BlockSpec((tn, d), lambda i: (i, 0)),
        out_shape=jax.ShapeDtypeStruct((n_pad, d), jnp.float32),
        compiler_params=_PAR1,
    )(jnp.pad(x, pad), jnp.pad(q, pad), jnp.pad(rnd, pad))
    return out[:n]


# ----------------------------------------------------------------------------
# AVQ module (forward pass)
# ----------------------------------------------------------------------------
class AVQPallas:
    def __init__(self, num_stages, vq_bitrate_per_stage, data_dim, beam_width,
                 key, discard_threshold=0.01):
        self.num_stages = num_stages
        self.num_codebooks = int(2 ** vq_bitrate_per_stage)
        self.data_dim = data_dim
        self.beam_width = beam_width
        self.eps = EPS
        self.discard_threshold = discard_threshold
        self.total_codebooks = num_stages * self.num_codebooks

        nc = self.num_codebooks
        cbs = []
        for _ in range(num_stages):
            key, sub = jax.random.split(key)
            cbs.append(jax.random.uniform(
                sub, (nc, data_dim), minval=-1.0 / nc, maxval=1.0 / nc,
                dtype=jnp.float32))
        # device-resident codebook used by every kernel call (no per-call H2D)
        self.codebooks_dev = jnp.concatenate(cbs, axis=0)            # (M, D)
        self.codebooks = np.asarray(self.codebooks_dev)              # host copy (debug only)
        self.codebooks_used = np.zeros(self.total_codebooks, dtype=np.int32)

        # Pad the codebook column dimension to a multiple of 128 once so every
        # distance output is lane-dense; padded columns carry +inf ||c||^2 so
        # they can never be selected.  The padded codebook is pre-scaled by 2
        # (static) so the kernel epilogue drops one multiply per element.
        m = self.total_codebooks
        mp = _round_up(m, 128)
        if mp > _MAX_COL_TILE:
            mp = _round_up(mp, _MAX_COL_TILE)
        self.cb2_pad_dev = jnp.zeros((mp, data_dim), jnp.float32).at[:m].set(
            2.0 * self.codebooks_dev)
        cb_sq = jnp.sum(self.codebooks_dev * self.codebooks_dev, axis=1)
        self.cb_sq_pad_dev = jnp.full((1, mp), jnp.inf, jnp.float32).at[0, :m].set(cb_sq)

    # ------------------------------------------------------------------ forward
    def forward(self, input_data, train_mode, noise_key):
        x_dev = jnp.asarray(input_data, jnp.float32)
        best_tuples, selected_indices = self.main(x_dev)

        # additive gather + sum of the selected codebook entries, on device
        idx_dev = jnp.asarray(best_tuples.astype(np.int32))          # (B, S)
        final_input_quantized = jnp.sum(
            jnp.take(self.codebooks_dev, idx_dev, axis=0), axis=1)   # (B, D)

        random_vector = jax.random.normal(noise_key, x_dev.shape, dtype=jnp.float32)
        final_input_quantized_nsvq = _nsvq_dev(
            x_dev, final_input_quantized, random_vector)

        self.codebooks_used[selected_indices.astype(np.int64)] += 1
        used_entries = np.asarray(
            np.array_split(self.codebooks_used, self.num_stages, axis=0))

        if train_mode:
            return final_input_quantized_nsvq, used_entries
        return final_input_quantized, used_entries

    # --------------------------------------------------------------------- main
    def main(self, x_dev):
        self.batch_size = int(x_dev.shape[0])
        self._x_dev = x_dev
        tuples = np.full((self.batch_size, self.beam_width, self.num_stages), np.nan)
        idx0 = np.asarray(_initial_topk_dev(
            x_dev, self.cb2_pad_dev, self.cb_sq_pad_dev, beam_width=self.beam_width))
        tuples[:, :, 0] = idx0
        return self.beam_searching(tuples)

    # -------------------------------------------------------------- beam helpers
    def find_best_tuples(self, input_tuples, iter_number, indexing_tuples_prime):
        B, W, S = input_tuples.shape
        tuples_so_far = jnp.asarray(
            input_tuples[:, :, :iter_number + 1].astype(np.int32))   # (B, W, k)
        new_idx = np.asarray(_beam_step_topk_dev(
            self._x_dev, self.codebooks_dev, self.cb2_pad_dev, self.cb_sq_pad_dev,
            tuples_so_far, beam_width=self.beam_width,
            num_codebooks=self.num_codebooks, num_stages=self.num_stages,
            mult=iter_number + 1))                                    # (B*W, W)
        itp = indexing_tuples_prime.reshape(B * W, W, S)
        itp[:, :, iter_number + 1] = new_idx
        return itp.reshape(B, W * W, S)

    def mse_topk(self, indexing_tuples_prime, iter_number):
        B, wprime, _ = indexing_tuples_prime.shape
        w2 = self.beam_width ** 2
        k = iter_number + 2
        idx = indexing_tuples_prime[:, :, :k].astype(np.int32)       # (B, wprime, k)
        if wprime < w2:   # keep device shapes static; pads masked with +inf
            idx = np.concatenate(
                [idx, np.zeros((B, w2 - wprime, k), np.int32)], axis=1)
        penalty = np.zeros((w2,), np.float32)
        penalty[wprime:] = np.inf
        topk = _mse_topk_dev(self._x_dev, self.codebooks_dev, jnp.asarray(idx),
                             jnp.asarray(penalty), beam_width=self.beam_width)
        return np.asarray(topk)                                       # (B, beam_width)

    def beam_searching(self, input_tuples):
        B, W, S = input_tuples.shape
        for iter_number in range(self.num_stages - 1):
            indexing_tuples_prime = input_tuples.repeat(repeats=W, axis=1)
            indexing_tuples_prime = self.find_best_tuples(
                input_tuples, iter_number, indexing_tuples_prime)
            indexing_tuples_prime = np.unique(indexing_tuples_prime, axis=1)
            topk = self.mse_topk(indexing_tuples_prime, iter_number)  # device top-k
            if iter_number < self.num_stages - 2:
                batch_ids = np.repeat(np.arange(B), W)
                best = topk.reshape(-1)
                input_tuples = indexing_tuples_prime[batch_ids, best, :].reshape(B, W, S)
            else:
                best = topk[:, 0]                                     # argmin
                final_best_tuples = indexing_tuples_prime[np.arange(B), best, :]
                final_selected_indices = np.unique(final_best_tuples)
                return final_best_tuples, final_selected_indices


# ----------------------------------------------------------------------------
if __name__ == "__main__":
    key = jax.random.PRNGKey(0)
    k_cb, k_x, k_noise = jax.random.split(key, 3)

    num_stages = 3
    vq_bitrate_per_stage = 2      # -> 4 codebook entries per stage, 12 total
    data_dim = 32
    beam_width = 2
    batch = 8

    model = AVQPallas(num_stages, vq_bitrate_per_stage, data_dim, beam_width, k_cb)
    x = jax.random.normal(k_x, (batch, data_dim), dtype=jnp.float32)

    # ---- full forward (train + eval paths) ----------------------------------
    out_nsvq, used_entries = model.forward(x, train_mode=True, noise_key=k_noise)
    out_nsvq = jax.block_until_ready(out_nsvq)
    assert out_nsvq.shape == (batch, data_dim)
    assert out_nsvq.dtype == jnp.float32
    assert used_entries.shape == (num_stages, model.num_codebooks)
    assert bool(np.all(np.isfinite(np.asarray(out_nsvq))))

    out_eval, _ = model.forward(x, train_mode=False, noise_key=k_noise)
    out_eval = jax.block_until_ready(out_eval)
    assert out_eval.shape == (batch, data_dim)
    assert bool(np.all(np.isfinite(np.asarray(out_eval))))

    # ---- lightweight numerical checks of each Pallas kernel vs NumPy --------
    x_np = np.asarray(x)
    cb_np = np.asarray(model.codebooks_dev)

    d_dev = np.asarray(_pairwise_sq_distances(
        x, model.cb2_pad_dev, model.cb_sq_pad_dev))[:, :model.total_codebooks]
    d_ref = (np.sum(x_np ** 2, axis=1, keepdims=True)
             - 2.0 * x_np @ cb_np.T + np.sum(cb_np ** 2, axis=1)[None, :])
    assert np.allclose(d_dev, d_ref, rtol=1e-4, atol=1e-3)

    q_np = np.broadcast_to(cb_np[:4][None], (batch, 4, data_dim)).astype(np.float32)
    m_dev = np.asarray(_mse_rows(x, jnp.asarray(q_np)))
    m_ref = np.mean((x_np[:, None, :] - q_np) ** 2, axis=2)
    assert np.allclose(m_dev, m_ref, rtol=1e-4, atol=1e-5)

    rnd_np = np.asarray(jax.random.normal(k_noise, x.shape, dtype=jnp.float32))
    q0 = np.sum(cb_np[np.zeros((batch, num_stages), np.int64)], axis=1).astype(np.float32)
    ns_dev = np.asarray(_nsvq_dev(x, jnp.asarray(q0), jnp.asarray(rnd_np)))
    nq = np.sqrt(np.sum((x_np - q0) ** 2, axis=1, keepdims=True))
    nr = np.sqrt(np.sum(rnd_np ** 2, axis=1, keepdims=True))
    ns_ref = x_np + (nq / nr + EPS) * rnd_np
    assert np.allclose(ns_dev, ns_ref, rtol=1e-4, atol=1e-5)

    print("KERNEL_OK")
</pallas_src>

<mosaic_0001>
module attributes {stable_mosaic.version = 11 : i64} {
  func.func @_distance_kernel(%arg0: i32, %arg1: i32, %arg2: memref<8x32xf32, #tpu.memory_space<vmem>>, %arg3: memref<8x1xf32, #tpu.memory_space<vmem>>, %arg4: memref<128x32xf32, #tpu.memory_space<vmem>>, %arg5: memref<1x128xf32, #tpu.memory_space<vmem>>, %arg6: memref<8x128xf32, #tpu.memory_space<vmem>>) attributes {dimension_semantics = [#tpu.dimension_semantics<parallel>, #tpu.dimension_semantics<parallel>], iteration_bounds = array<i64: 1, 1>, scalar_prefetch = 0 : i64, scratch_operands = 0 : i64, tpu.core_type = #tpu.core_type<tc>, window_params = [{transform_indices = @transform_0, window_bounds = array<i64: 8, 32>}, {transform_indices = @transform_1, window_bounds = array<i64: 8, 1>}, {transform_indices = @transform_2, window_bounds = array<i64: 128, 32>}, {transform_indices = @transform_3, window_bounds = array<i64: 1, 128>}, {transform_indices = @transform_4, window_bounds = array<i64: 8, 128>}]} {
    %c0 = arith.constant 0 : index
    %c0_0 = arith.constant 0 : index
    %0 = vector.load %arg2[%c0, %c0_0] : memref<8x32xf32, #tpu.memory_space<vmem>>, vector<8x32xf32>
    %c0_1 = arith.constant 0 : index
    %c0_2 = arith.constant 0 : index
    %1 = vector.load %arg4[%c0_1, %c0_2] : memref<128x32xf32, #tpu.memory_space<vmem>>, vector<128x32xf32>
    %cst = arith.constant dense<0.000000e+00> : vector<8x128xf32>
    %2 = tpu.matmul %0, %1, %cst {dimension_numbers = #tpu.dot_dimension_numbers<[1], [1], [0], [0], [0, 0, 1, 0], [], []>} : vector<8x32xf32>, vector<128x32xf32>, vector<8x128xf32> -> vector<8x128xf32>
    %c0_3 = arith.constant 0 : index
    %c0_4 = arith.constant 0 : index
    %3 = vector.load %arg3[%c0_3, %c0_4] : memref<8x1xf32, #tpu.memory_space<vmem>>, vector<8x1xf32>
    %4 = vector.broadcast %3 : vector<8x1xf32> to vector<8x128xf32>
    %5 = arith.subf %4, %2 : vector<8x128xf32>
    %c0_5 = arith.constant 0 : index
    %c0_6 = arith.constant 0 : index
    %6 = vector.load %arg5[%c0_5, %c0_6] : memref<1x128xf32, #tpu.memory_space<vmem>>, vector<1x128xf32>
    %7 = vector.broadcast %6 : vector<1x128xf32> to vector<8x128xf32>
    %8 = arith.addf %5, %7 : vector<8x128xf32>
    %c0_7 = arith.constant 0 : index
    %c0_8 = arith.constant 0 : index
    %9 = vector.load %arg6[%c0_7, %c0_8] : memref<8x128xf32, #tpu.memory_space<vmem>>, vector<8x128xf32>
    tpu.vector_store %arg6[%c0_7, %c0_8], %8 {strides = array<i32>} : memref<8x128xf32, #tpu.memory_space<vmem>>, vector<8x128xf32>,
    return
  }
  func.func @transform_0(%arg0: i32, %arg1: i32) -> (i32, i32) {
    %c0_i32 = arith.constant 0 : i32
    %c0_i32_0 = arith.constant 0 : i32
    return %arg1, %c0_i32 : i32, i32
  }
  func.func @transform_1(%arg0: i32, %arg1: i32) -> (i32, i32) {
    %c0_i32 = arith.constant 0 : i32
    %c0_i32_0 = arith.constant 0 : i32
    return %arg1, %c0_i32 : i32, i32
  }
  func.func @transform_2(%arg0: i32, %arg1: i32) -> (i32, i32) {
    %c0_i32 = arith.constant 0 : i32
    %c0_i32_0 = arith.constant 0 : i32
    return %arg0, %c0_i32 : i32, i32
  }
  func.func @transform_3(%arg0: i32, %arg1: i32) -> (i32, i32) {
    %c0_i32 = arith.constant 0 : i32
    %c0_i32_0 = arith.constant 0 : i32
    return %c0_i32, %arg0 : i32, i32
  }
  func.func @transform_4(%arg0: i32, %arg1: i32) -> (i32, i32) {
    %c0_i32 = arith.constant 0 : i32
    return %arg1, %arg0 : i32, i32
  }
}

</mosaic_0001>

<bundles_post_ra>
// kernel: _initial_topk_dev.1
= control target key start
LH: loop header
LB: loop body
LE: loop exit
PB: predicated region body
PF: predicated region fallthrough
CT: control target
= control target key end

     0   :  { %vm34_vm0 = vcmask 261120   ;;  %v283_v0 = vmov 0.0|0.0   ;;  %vm284_vm2 = vmmov 0   ;;  %v285_v4 = vmov 0.0   ;;  %s395_s2 = inlined_call_operand.vmem [shape: f32[128,32], index: 2, kind: input, shape index: {}]   ;;  %s396_s1 = inlined_call_operand.vmem [shape: f32[8,1], index: 1, kind: input, shape index: {}]   ;;  %s397_s0 = inlined_call_operand.vmem [shape: f32[8,32], index: 0, kind: input, shape index: {}]   ;;  %s398_s3 = inlined_call_operand.vmem [shape: f32[1,128], index: 3, kind: input, shape index: {}]   ;;  %s399_s4 = inlined_call_operand.vmem [shape: f32[8,128], index: 4, kind: output, shape index: {}]  }
   0x1   :  { %246 = vmatprep.subr.bf16.mxu0 %v283_v0  ;;  %v18_v1 = vld [vmem:[%s395_s2] sm:$0xff]  ;;  %v19_v2 = vld [vmem:[%s395_s2 + $0x8] sm:$0xff]  ;;  %vm320_vm1 = vmpackc.low %vm34_vm0, %vm34_vm0  ;;  %243 = vmatprep.mubr.msk.f32.mxu0 %vm284_vm2, %v285_v4  ;;  %v286_v6 = vmov 0  }
   0x2   :  { %v247_v5 = vpack.c.bf16 %v19_v2, %v18_v1  ;;  %282 = vset.pattern.permute.xlu0 %v286_v6  ;;  %v20_v7 = vld [vmem:[%s395_s2 + $0x10] sm:$0xff]  ;;  %v21_v8 = vld [vmem:[%s395_s2 + $0x18] sm:$0xff]  ;;  %v156_v9 = vld [vmem:[%s396_s1] sm:$0xff] }
   0x3   :  { %v251_v10 = vpack.c.bf16 %v21_v8, %v20_v7  ;;  %159 = vperm.xlu0 %282, %v156_v9   ;;  %v22_v11 = vld [vmem:[%s395_s2 + $0x20] sm:$0xff]  ;;  %v23_v12 = vld [vmem:[%s395_s2 + $0x28] sm:$0xff]  ;;  %v24_v14 = vld [vmem:[%s395_s2 + $0x30] sm:$0xff] }
   0x4   :  { %249 = vmatpush3.bf16.xpose.msk.msra.mxu0 %vm320_vm1, %v247_v5  ;;  %v255_v13 = vpack.c.bf16 %v23_v12, %v22_v11  ;;  %v25_v15 = vld [vmem:[%s395_s2 + $0x38] sm:$0xff]  ;;  %v26_v17 = vld [vmem:[%s395_s2 + $0x40] sm:$0xff]  ;;  %v27_v18 = vld [vmem:[%s395_s2 + $0x48] sm:$0xff] }
   0x5   :  { %250 = vmatprep.subr.bf16.mxu0 %v283_v0  ;;  %v259_v16 = vpack.c.bf16 %v25_v15, %v24_v14  ;;  %v263_v19 = vpack.c.bf16 %v27_v18, %v26_v17  ;;  %v28_v20 = vld [vmem:[%s395_s2 + $0x50] sm:$0xff]  ;;  %v29_v21 = vld [vmem:[%s395_s2 + $0x58] sm:$0xff]  ;;  %v30_v23 = vld [vmem:[%s395_s2 + $0x60] sm:$0xff] }
   0x6   :  { %v267_v22 = vpack.c.bf16 %v29_v21, %v28_v20  ;;  %v31_v24 = vld [vmem:[%s395_s2 + $0x68] sm:$0xff]  ;;  %v32_v26 = vld [vmem:[%s395_s2 + $0x70] sm:$0xff]  ;;  %v33_v27 = vld [vmem:[%s395_s2 + $0x78] sm:$0xff] }
   0x7   :  { %v271_v25 = vpack.c.bf16 %v31_v24, %v30_v23  ;;  %v275_v28 = vpack.c.bf16 %v33_v27, %v32_v26  ;;  %v17_v29 = vld [vmem:[%s397_s0] sm:$0xff] }
   0x8   :  { %v193_v32 = vld [vmem:[%s398_s3] ss:$0 sm:$0xff] }
   0xc   :  { %253 = vmatpush3.bf16.xpose.msk.msra.mxu0 %vm320_vm1, %v251_v10 }
   0xd   :  { %254 = vmatprep.subr.bf16.mxu0 %v283_v0 }
  0x14   :  { %257 = vmatpush3.bf16.xpose.msk.msra.mxu0 %vm320_vm1, %v255_v13 }
  0x15   :  { %258 = vmatprep.subr.bf16.mxu0 %v283_v0 }
  0x1c   :  { %261 = vmatpush3.bf16.xpose.msk.msra.mxu0 %vm320_vm1, %v259_v16 }
  0x1d   :  { %262 = vmatprep.subr.bf16.mxu0 %v283_v0 }
  0x24   :  { %265 = vmatpush3.bf16.xpose.msk.msra.mxu0 %vm320_vm1, %v263_v19 }
  0x25   :  { %266 = vmatprep.subr.bf16.mxu0 %v283_v0 }
  0x2c   :  { %269 = vmatpush3.bf16.xpose.msk.msra.mxu0 %vm320_vm1, %v267_v22 }
  0x2d   :  { %270 = vmatprep.subr.bf16.mxu0 %v283_v0 }
  0x34   :  { %273 = vmatpush3.bf16.xpose.msk.msra.mxu0 %vm320_vm1, %v271_v25 }
  0x35   :  { %274 = vmatprep.subr.bf16.mxu0 %v283_v0 }
  0x3c   :  { %277 = vmatpush3.bf16.xpose.msk.msra.mxu0 %vm320_vm1, %v275_v28 }
  0x43   :  { %244 = vmatmul.mubr.msk.f32.vlgmr.msra.gmra.mrb[0].mxu0 %vm34_vm0, %v17_v29 }
  0x82   :  { %v160_v30 = vpop.permute.xlu0 %159 }
 0x116   :  { %v152_v31 = vpop.f32.mrb[0].mxu0 }
 0x117   :  { %v162_v33 = vsub.f32 %v160_v30, %v152_v31  ;;  %v245_v34 = vpop.f32.mrb[1].mxu0 }
 0x119   :  { %v170_v35 = vadd.f32 %v193_v32, %v162_v33 }
 0x11b   :  { %171 = vst [vmem:[%s399_s4] sm:$0xff] %v170_v35 }

</bundles_post_ra>
